<compile_context>
chip_gen: v5e
topology: v5e:2x2
jax: 0.10.0
libtpu: 0.0.40
codegen_flags: <defaults>
</compile_context>

<pallas_src>
import jax
import jax.numpy as jnp
from jax import lax
from jax.experimental import pallas as pl
from jax.experimental.pallas import tpu as pltpu

_EPS = 1e-12  # matches torch.nn.functional.normalize default eps


def _l2_normalize(x):
    # F.normalize(x, dim=-1): x / max(||x||_2, eps)
    # == x * rsqrt(max(sum(x^2), eps^2)); rsqrt runs on the EUP slot (free here).
    sumsq = jnp.sum(x * x, axis=-1, keepdims=True)
    return x * lax.rsqrt(jnp.maximum(sumsq, _EPS * _EPS))


def _minmax(x):
    return (x - jnp.min(x)) / (jnp.max(x) - jnp.min(x))


def _make_kernel(B):
    def _kernel(f_ref, fm_ref, out_ref):
        # f_ref  : [2B, D] = [graph1 ; graph2]           (main branch)
        # fm_ref : [2B, D] = [graph1_m ; graph2_m]       ("no_grad" branch)
        gn = _l2_normalize(f_ref[...])      # one normalize pass per input slab
        gm = _l2_normalize(fm_ref[...])
        g1m = gm[:B]
        g2m = gm[B:]

        # ---- "no_grad" branch: weighting matrix w (no B*B matmul) ----
        # diag(sim_m)[i]   = g1m[i] . g2m[i]
        # rowsum(sim_m)[i] = g1m[i] . sum_j g2m[j]
        # colsum(sim_m)[j] = g2m[j] . sum_i g1m[i]
        diag = jnp.sum(g1m * g2m, axis=-1)                       # [B]
        s_g2m = jnp.sum(g2m, axis=0, keepdims=True)              # [1, D]
        s_g1m = jnp.sum(g1m, axis=0, keepdims=True)              # [1, D]
        row_sum = jnp.sum(g1m * s_g2m, axis=-1)                  # [B]
        col_sum = jnp.sum(g2m * s_g1m, axis=-1)                  # [B]
        w_vec = _minmax((diag / row_sum + diag / col_sum) * 0.5)
        # After min-max, w spans exactly [0, 1], so the module's second min-max
        # on outer(w, w) is an exact identity and is dropped.
        w_mat = w_vec[:, None] * w_vec[None, :]                  # [B, B]

        # ---- main branch: one Gram matmul gives all four similarity blocks ----
        # dynamic_temperature cancels exactly: (t*a - t*b)^2 / t^2 == (a - b)^2.
        G = lax.dot_general(gn, gn, (((1,), (1,)), ((), ())),
                            preferred_element_type=jnp.float32)  # [2B, 2B]
        s11 = G[:B, :B]
        s22 = G[B:, B:]
        s12 = G[:B, B:]
        s21 = G[B:, :B]
        within = s11 - s22
        cross = s12 - s21
        acc = w_mat * (within * within + cross * cross)          # fused loss pass
        # (mean * B) for each BxB term == sum / B; both terms share one reduce.
        out_ref[0, 0] = jnp.sum(acc) * (1.0 / B)

    return _kernel


def distill_quadratic_contrast(feature, feature_m, dynamic_temperature=None,
                               dynamic_temperature_m=None):
    """feature, feature_m: [2, B, D]. dynamic_temperature cancels out of the
    loss; dynamic_temperature_m is unused in the PyTorch forward."""
    del dynamic_temperature, dynamic_temperature_m
    feature = jnp.asarray(feature, jnp.float32)
    feature_m = jnp.asarray(feature_m, jnp.float32)
    _, B, D = feature.shape
    f = feature.reshape(2 * B, D)       # free views -- no wrapper-side copies
    fm = feature_m.reshape(2 * B, D)

    cost = pl.CostEstimate(
        flops=2 * (2 * B) * (2 * B) * D + 24 * B * B + 16 * B * D,
        transcendentals=4 * B,                   # rsqrt per feature row
        bytes_accessed=2 * (4 * (2 * B) * D) + 4,
    )

    out = pl.pallas_call(
        _make_kernel(B),
        out_shape=jax.ShapeDtypeStruct((1, 1), jnp.float32),
        in_specs=[pl.BlockSpec(memory_space=pltpu.MemorySpace.VMEM),
                  pl.BlockSpec(memory_space=pltpu.MemorySpace.VMEM)],
        out_specs=pl.BlockSpec(memory_space=pltpu.MemorySpace.SMEM),
        cost_estimate=cost,
    )(f, fm)
    return out[0, 0]


def _mm_t(a, b):
    # a @ b.T in full f32 precision (mirrors PyTorch's f32 matmul).
    return lax.dot_general(a, b, (((1,), (1,)), ((), ())),
                           precision=lax.Precision.HIGHEST,
                           preferred_element_type=jnp.float32)


def _reference(feature, feature_m, dynamic_temperature):
    # Pure-JAX reference mirroring the PyTorch forward exactly (incl. temp).
    def norm(x):
        n = jnp.sqrt(jnp.sum(x * x, axis=-1, keepdims=True))
        return x / jnp.maximum(n, _EPS)

    g1, g2 = norm(feature[0]), norm(feature[1])
    g1m, g2m = norm(feature_m[0]), norm(feature_m[1])
    B = g1.shape[0]
    sim_m = _mm_t(g1m, g2m)
    d = jnp.diag(sim_m)
    w = (d / sim_m.sum(axis=1) + d / sim_m.sum(axis=0)) / 2
    w = _minmax(w)
    W = _minmax(jnp.outer(w, w))
    t = jnp.exp(dynamic_temperature)
    s12, s21 = t * _mm_t(g1, g2), t * _mm_t(g2, g1)
    s11, s22 = t * _mm_t(g1, g1), t * _mm_t(g2, g2)
    within = jnp.mean(W * (s11 - s22) ** 2) * B / (t * t)
    cross = jnp.mean(W * (s12 - s21) ** 2) * B / (t * t)
    return within + cross


if __name__ == "__main__":
    key = jax.random.PRNGKey(0)
    k1, k2 = jax.random.split(key)
    B, D = 8, 32
    feature = jax.random.normal(k1, (2, B, D), dtype=jnp.float32)
    feature_m = jax.random.normal(k2, (2, B, D), dtype=jnp.float32)
    dynamic_temperature = jnp.float32(0.3)
    dynamic_temperature_m = jnp.float32(0.25)  # unused, mirrors signature

    loss = distill_quadratic_contrast(
        feature, feature_m, dynamic_temperature, dynamic_temperature_m
    )
    loss = jax.block_until_ready(loss)

    ref = _reference(feature, feature_m, dynamic_temperature)
    assert jnp.allclose(loss, ref, rtol=1e-4, atol=1e-5), (loss, ref)
    print("KERNEL_OK")
</pallas_src>

<mosaic_0001>
module attributes {stable_mosaic.version = 11 : i64} {
  func.func @_kernel(%arg0: memref<16x32xf32, #tpu.memory_space<vmem>>, %arg1: memref<16x32xf32, #tpu.memory_space<vmem>>, %arg2: memref<1x1xf32, #tpu.memory_space<smem>>) attributes {dimension_semantics = [], scalar_prefetch = 0 : i64, scratch_operands = 0 : i64, tpu.core_type = #tpu.core_type<tc>} {
    %c0 = arith.constant 0 : index
    %c0_0 = arith.constant 0 : index
    %0 = vector.load %arg0[%c0, %c0_0] : memref<16x32xf32, #tpu.memory_space<vmem>>, vector<16x32xf32>
    %1 = arith.mulf %0, %0 : vector<16x32xf32>
    %cst = arith.constant dense<0.000000e+00> : vector<16xf32>
    %2 = vector.multi_reduction <add>, %1, %cst [1] : vector<16x32xf32> to vector<16xf32>
    %3 = vector.shape_cast %2 : vector<16xf32> to vector<16x1xf32>
    %cst_1 = arith.constant 1.000000e-24 : f32
    %4 = vector.broadcast %cst_1 : f32 to vector<16x1xf32>
    %5 = arith.maximumf %3, %4 : vector<16x1xf32>
    %6 = math.rsqrt %5 : vector<16x1xf32>
    %7 = vector.broadcast %6 : vector<16x1xf32> to vector<16x32xf32>
    %8 = arith.mulf %0, %7 : vector<16x32xf32>
    %c0_2 = arith.constant 0 : index
    %c0_3 = arith.constant 0 : index
    %9 = vector.load %arg1[%c0_2, %c0_3] : memref<16x32xf32, #tpu.memory_space<vmem>>, vector<16x32xf32>
    %10 = arith.mulf %9, %9 : vector<16x32xf32>
    %cst_4 = arith.constant dense<0.000000e+00> : vector<16xf32>
    %11 = vector.multi_reduction <add>, %10, %cst_4 [1] : vector<16x32xf32> to vector<16xf32>
    %12 = vector.shape_cast %11 : vector<16xf32> to vector<16x1xf32>
    %cst_5 = arith.constant 1.000000e-24 : f32
    %13 = vector.broadcast %cst_5 : f32 to vector<16x1xf32>
    %14 = arith.maximumf %12, %13 : vector<16x1xf32>
    %15 = math.rsqrt %14 : vector<16x1xf32>
    %16 = vector.broadcast %15 : vector<16x1xf32> to vector<16x32xf32>
    %17 = arith.mulf %9, %16 : vector<16x32xf32>
    %18 = vector.extract_strided_slice %17 {offsets = [0, 0], sizes = [8, 32], strides = [1, 1]} : vector<16x32xf32> to vector<8x32xf32>
    %19 = vector.extract_strided_slice %17 {offsets = [8, 0], sizes = [8, 32], strides = [1, 1]} : vector<16x32xf32> to vector<8x32xf32>
    %20 = arith.mulf %18, %19 : vector<8x32xf32>
    %cst_6 = arith.constant dense<0.000000e+00> : vector<8xf32>
    %21 = vector.multi_reduction <add>, %20, %cst_6 [1] : vector<8x32xf32> to vector<8xf32>
    %cst_7 = arith.constant dense<0.000000e+00> : vector<32xf32>
    %22 = vector.multi_reduction <add>, %19, %cst_7 [0] : vector<8x32xf32> to vector<32xf32>
    %23 = vector.shape_cast %22 : vector<32xf32> to vector<1x32xf32>
    %cst_8 = arith.constant dense<0.000000e+00> : vector<32xf32>
    %24 = vector.multi_reduction <add>, %18, %cst_8 [0] : vector<8x32xf32> to vector<32xf32>
    %25 = vector.shape_cast %24 : vector<32xf32> to vector<1x32xf32>
    %26 = vector.broadcast %23 : vector<1x32xf32> to vector<8x32xf32>
    %27 = arith.mulf %18, %26 : vector<8x32xf32>
    %cst_9 = arith.constant dense<0.000000e+00> : vector<8xf32>
    %28 = vector.multi_reduction <add>, %27, %cst_9 [1] : vector<8x32xf32> to vector<8xf32>
    %29 = vector.broadcast %25 : vector<1x32xf32> to vector<8x32xf32>
    %30 = arith.mulf %19, %29 : vector<8x32xf32>
    %cst_10 = arith.constant dense<0.000000e+00> : vector<8xf32>
    %31 = vector.multi_reduction <add>, %30, %cst_10 [1] : vector<8x32xf32> to vector<8xf32>
    %32 = arith.divf %21, %28 : vector<8xf32>
    %33 = arith.divf %21, %31 : vector<8xf32>
    %34 = arith.addf %32, %33 : vector<8xf32>
    %cst_11 = arith.constant 5.000000e-01 : f32
    %35 = vector.broadcast %cst_11 : f32 to vector<8xf32>
    %36 = arith.mulf %34, %35 : vector<8xf32>
    %37 = vector.shape_cast %36 : vector<8xf32> to vector<1x8xf32>
    %cst_12 = arith.constant dense<0x7F800000> : vector<1xf32>
    %38 = vector.multi_reduction <minimumf>, %37, %cst_12 [1] : vector<1x8xf32> to vector<1xf32>
    %39 = vector.shape_cast %38 : vector<1xf32> to vector<1x1xf32>
    %40 = vector.extract %39[0, 0] : f32 from vector<1x1xf32>
    %41 = vector.broadcast %40 : f32 to vector<8xf32>
    %42 = arith.subf %36, %41 : vector<8xf32>
    %43 = vector.shape_cast %36 : vector<8xf32> to vector<1x8xf32>
    %cst_13 = arith.constant dense<0xFF800000> : vector<1xf32>
    %44 = vector.multi_reduction <maximumf>, %43, %cst_13 [1] : vector<1x8xf32> to vector<1xf32>
    %45 = vector.shape_cast %44 : vector<1xf32> to vector<1x1xf32>
    %46 = vector.extract %45[0, 0] : f32 from vector<1x1xf32>
    %47 = vector.shape_cast %36 : vector<8xf32> to vector<1x8xf32>
    %cst_14 = arith.constant dense<0x7F800000> : vector<1xf32>
    %48 = vector.multi_reduction <minimumf>, %47, %cst_14 [1] : vector<1x8xf32> to vector<1xf32>
    %49 = vector.shape_cast %48 : vector<1xf32> to vector<1x1xf32>
    %50 = vector.extract %49[0, 0] : f32 from vector<1x1xf32>
    %51 = arith.subf %46, %50 : f32
    %52 = vector.broadcast %51 : f32 to vector<8xf32>
    %53 = arith.divf %42, %52 : vector<8xf32>
    %54 = vector.shape_cast %53 : vector<8xf32> to vector<8x1xf32>
    %55 = vector.shape_cast %53 : vector<8xf32> to vector<1x8xf32>
    %56 = vector.broadcast %54 : vector<8x1xf32> to vector<8x8xf32>
    %57 = vector.broadcast %55 : vector<1x8xf32> to vector<8x8xf32>
    %58 = arith.mulf %56, %57 : vector<8x8xf32>
    %cst_15 = arith.constant dense<0.000000e+00> : vector<16x16xf32>
    %59 = tpu.matmul %8, %8, %cst_15 {dimension_numbers = #tpu.dot_dimension_numbers<[1], [1], [0], [0], [0, 0, 1, 0], [], []>} : vector<16x32xf32>, vector<16x32xf32>, vector<16x16xf32> -> vector<16x16xf32>
    %60 = vector.extract_strided_slice %59 {offsets = [0, 0], sizes = [8, 8], strides = [1, 1]} : vector<16x16xf32> to vector<8x8xf32>
    %61 = vector.extract_strided_slice %59 {offsets = [8, 8], sizes = [8, 8], strides = [1, 1]} : vector<16x16xf32> to vector<8x8xf32>
    %62 = vector.extract_strided_slice %59 {offsets = [0, 8], sizes = [8, 8], strides = [1, 1]} : vector<16x16xf32> to vector<8x8xf32>
    %63 = vector.extract_strided_slice %59 {offsets = [8, 0], sizes = [8, 8], strides = [1, 1]} : vector<16x16xf32> to vector<8x8xf32>
    %64 = arith.subf %60, %61 : vector<8x8xf32>
    %65 = arith.subf %62, %63 : vector<8x8xf32>
    %66 = arith.mulf %64, %64 : vector<8x8xf32>
    %67 = arith.mulf %65, %65 : vector<8x8xf32>
    %68 = arith.addf %66, %67 : vector<8x8xf32>
    %69 = arith.mulf %58, %68 : vector<8x8xf32>
    %70 = vector.shape_cast %69 : vector<8x8xf32> to vector<1x8x8xf32>
    %cst_16 = arith.constant dense<0.000000e+00> : vector<1xf32>
    %71 = vector.multi_reduction <add>, %70, %cst_16 [1, 2] : vector<1x8x8xf32> to vector<1xf32>
    %72 = vector.shape_cast %71 : vector<1xf32> to vector<1x1x1xf32>
    %73 = vector.extract %72[0, 0, 0] : f32 from vector<1x1x1xf32>
    %cst_17 = arith.constant 1.250000e-01 : f32
    %74 = arith.mulf %73, %cst_17 : f32
    %c0_18 = arith.constant 0 : index
    %c0_19 = arith.constant 0 : index
    %75 = memref.load %arg2[%c0_18, %c0_19] : memref<1x1xf32, #tpu.memory_space<smem>>
    memref.store %74, %arg2[%c0_18, %c0_19] : memref<1x1xf32, #tpu.memory_space<smem>>
    return
  }
}

</mosaic_0001>

<bundles_post_ra>
// kernel: tpu_custom_call.1
= control target key start
LH: loop header
LB: loop body
LE: loop exit
PB: predicated region body
PF: predicated region fallthrough
CT: control target
= control target key end

     0   :  { %7 = vsyncpa [#allocation3], 0  ;;  %s457_s0 = inlined_call_operand.hbm [shape: f32[16,32], index: 0, kind: input, shape index: {}]   ;;  %s458_s1 = inlined_call_operand.hbm [shape: f32[16,32], index: 1, kind: input, shape index: {}]   ;;  %s459_s2 = inlined_call_operand.hbm [shape: f32[1,1], index: 2, kind: output, shape index: {}]  }
   0x1   :  { %8 = vsyncpa [#allocation6], 0 }
   0x2   :  { %9 = vsyncpa [#allocation4], 0  ;;  %s14_s11 = sshll.u32 %s457_s0, 4  ;;  %s397_s12 = smov [#allocation2]   ;;  %s15_s11 = int_to_ptr.hbm [resolvable:$true] %s14_s11 }
   0x3   :  { %s16_s13 = sshll.u32 %s397_s12, 4  ;;  %s27_s16 = sshll.u32 %s458_s1, 4  ;;  %s17_s13 = int_to_ptr.vmem [resolvable:$true] %s16_s13  ;;  %s28_s16 = int_to_ptr.hbm [resolvable:$true] %s27_s16 }
   0x4   :  { %s398_s17 = smov 128   ;;  %s399_s18 = smov 8  }
   0x5   :  { %22 = dma.hbm_to_vmem [thread:$0]  %s15_s11, 256, %s17_s13, [#allocation3], %s398_s17, %s398_s17, %s399_s18  }
   0x6   :  { %s400_s19 = smov [#allocation5]  }
   0x7   :  { %s29_s20 = sshll.u32 %s400_s19, 4  ;;  %s30_s20 = int_to_ptr.vmem [resolvable:$true] %s29_s20 }
   0x8   :  { %35 = dma.hbm_to_vmem [thread:$0]  %s28_s16, 256, %s30_s20, [#allocation6], %s398_s17, %s398_s17, %s399_s18  }
   0x9   :  { %391 = dma.done.wait [#allocation3], 256  }
   0xa   :  { %392 = vsyncadd [#allocation3], 4294967040 }
   0xb   :  { %393 = dma.done.wait [#allocation6], 256  }
   0xc   :  { %394 = vsyncadd [#allocation6], 4294967040  ;;  %vm48_vm0 = vcmask 261120   ;;  %v79_v0 = vld [vmem:[#allocation5] sm:$0xff]  ;;  %v45_v1 = vld [vmem:[#allocation2 + $0x8] sm:$0xff]  ;;  %s401_s0 = smov 120  }
   0xd   :  { %v81_v2 = vmul.f32 %v79_v0, %v79_v0  ;;  %v47_v3 = vmul.f32 %v45_v1, %v45_v1  ;;  %v426_v4 = vld [vmem:[#allocation5 + $0x8] sm:$0xff]  ;;  %v428_v5 = vld [vmem:[#allocation2] sm:$0xff]  ;;  %s287_s25 = sshll.u32 %s459_s2, 4  ;;  %s402_s28 = smov [#allocation7]   ;;  %s288_s25 = int_to_ptr.hbm [resolvable:$true] %s287_s25 }
   0xe   :  { %v82_v8 = vmul.f32 %v426_v4, %v426_v4  ;;  %v46_v9 = vmul.f32 %v428_v5, %v428_v5 }
   0xf   :  { %v83_v6 = vsel %vm48_vm0, %v81_v2, 0.0  ;;  %v52_v7 = vsel %vm48_vm0, %v47_v3, 0.0 }
  0x10   :  { %84 = vadd.xlane.f32.xlu1 %v83_v6  ;;  %53 = vadd.xlane.f32.xlu0 %v52_v7  ;;  %v86_v10 = vsel %vm48_vm0, %v82_v8, 0.0  ;;  %v49_v11 = vsel %vm48_vm0, %v46_v9, 0.0 }
  0x18   :  { %87 = vadd.xlane.f32.xlu1 %v86_v10  ;;  %50 = vadd.xlane.f32.xlu0 %v49_v11 }
  0x83   :  { %v85_v12 = vpop.xlane.xlu1 %84  ;;  %v54_v13 = vpop.xlane.xlu0 %53 }
  0x84   :  { %v89_v14 = vmax.f32 %v85_v12, 1e-24  ;;  %v56_v15 = vmax.f32 %v54_v13, 1e-24 }
  0x86   :  { %317 = vrsqrt.f32 %v89_v14  ;;  %vm97_vm1 = vweird.f32 %v89_v14  ;;  %vm73_vm5 = vweird.f32 %v56_v15 }
  0x87   :  { %319 = vrsqrt.f32 %v56_v15 }
  0x8b   :  { %v88_v16 = vpop.xlane.xlu1 %87  ;;  %v51_v17 = vpop.xlane.xlu0 %50 }
  0x8c   :  { %v318_v18 = vpop.eup %317  ;;  %v90_v19 = vmax.f32 %v88_v16, 1e-24  ;;  %v55_v20 = vmax.f32 %v51_v17, 1e-24 }
  0x8d   :  { %v320_v21 = vpop.eup %319  ;;  %v92_v22 = vmul.f32 %v318_v18, %v89_v14  ;;  %vm98_vm2 = vweird.f32 %v318_v18 }
  0x8e   :  { %v68_v23 = vmul.f32 %v320_v21, %v56_v15  ;;  %321 = vrsqrt.f32 %v90_v19  ;;  %vm99_vm3 = vmor %vm97_vm1, %vm98_vm2  ;;  %vm74_vm4 = vweird.f32 %v320_v21  ;;  %vm107_vm7 = vweird.f32 %v90_v19 }
  0x8f   :  { %v93_v24 = vmul.f32 %v318_v18, %v92_v22  ;;  %323 = vrsqrt.f32 %v55_v20  ;;  %vm75_vm6 = vmor %vm73_vm5, %vm74_vm4  ;;  %vm63_vm11 = vweird.f32 %v55_v20 }
  0x90   :  { %v69_v25 = vmul.f32 %v320_v21, %v68_v23 }
  0x91   :  { %v94_v26 = vmul.f32 0.5, %v93_v24 }
  0x92   :  { %v70_v27 = vmul.f32 0.5, %v69_v25 }
  0x93   :  { %v95_v28 = vsub.f32 1.5, %v94_v26 }
  0x94   :  { %v322_v29 = vpop.eup %321  ;;  %v71_v30 = vsub.f32 1.5, %v70_v27 }
  0x95   :  { %v324_v31 = vpop.eup %323  ;;  %v96_v32 = vmul.f32 %v318_v18, %v95_v28  ;;  %v102_v33 = vmul.f32 %v322_v29, %v90_v19  ;;  %vm108_vm8 = vweird.f32 %v322_v29 }
  0x96   :  { %v58_v34 = vmul.f32 %v324_v31, %v55_v20  ;;  %v72_v35 = vmul.f32 %v320_v21, %v71_v30  ;;  %vm109_vm9 = vmor %vm107_vm7, %vm108_vm8  ;;  %vm64_vm10 = vweird.f32 %v324_v31 }
  0x97   :  { %v103_v36 = vmul.f32 %v322_v29, %v102_v33  ;;  %v100_v37 = vsel %vm99_vm3, %v318_v18, %v96_v32  ;;  %vm65_vm12 = vmor %vm63_vm11, %vm64_vm10 }
  0x98   :  { %v59_v38 = vmul.f32 %v324_v31, %v58_v34  ;;  %v76_v39 = vsel %vm75_vm6, %v320_v21, %v72_v35  ;;  %v111_v40 = vmul.f32 %v100_v37, %v79_v0 }
  0x99   :  { %v104_v41 = vmul.f32 0.5, %v103_v36  ;;  %v78_v42 = vmul.f32 %v76_v39, %v45_v1 }
  0x9a   :  { %v60_v43 = vmul.f32 0.5, %v59_v38  ;;  %v124_v44 = vsel %vm48_vm0, %v111_v40, 0.0 }
  0x9b   :  { %v105_v45 = vsub.f32 1.5, %v104_v41  ;;  %299 = vmatpush.xpose.msk.msra.mxu0 %vm48_vm0, %v78_v42  ;;  %303 = vmatpush.xpose.msk.msra.mxu1 %vm48_vm0, %v78_v42  ;;  %v125_v46 = vrot.slane %v124_v44, 4 }
  0x9c   :  { %v61_v47 = vsub.f32 1.5, %v60_v43 }
  0x9d   :  { %v106_v48 = vmul.f32 %v322_v29, %v105_v45  ;;  %v126_v51 = vadd.f32 %v125_v46, %v124_v44 }
  0x9e   :  { %v62_v49 = vmul.f32 %v324_v31, %v61_v47 }
  0x9f   :  { %v110_v50 = vsel %vm109_vm9, %v322_v29, %v106_v48  ;;  %v127_v58 = vrot.slane %v126_v51, 2  ;;  %vm268_vm9 = vcmask 64512  }
  0xa0   :  { %v112_v52 = vmul.f32 %v110_v50, %v426_v4  ;;  %v66_v53 = vsel %vm65_vm12, %v324_v31, %v62_v49 }
  0xa1   :  { %v77_v54 = vmul.f32 %v66_v53, %v428_v5  ;;  %v128_v62 = vadd.f32 %v127_v58, %v126_v51 }
  0xa2   :  { %v117_v55 = vsel %vm48_vm0, %v112_v52, 0.0  ;;  %v113_v56 = vmul.f32 %v112_v52, %v111_v40 }
  0xa3   :  { %300 = vmatpush.xpose.msk.msra.mxu0 %vm48_vm0, %v77_v54  ;;  %304 = vmatpush.xpose.msk.msra.mxu1 %vm48_vm0, %v77_v54  ;;  %v118_v57 = vrot.slane %v117_v55, 4  ;;  %v129_v1 = vrot.slane %v128_v62, 1 }
  0xa4   :  { %v114_v59 = vsel %vm48_vm0, %v113_v56, 0.0 }
  0xa5   :  { %v119_v60 = vadd.f32 %v118_v57, %v117_v55  ;;  %115 = vadd.xlane.f32.xlu0 %v114_v59  ;;  %v130_v4 = vadd.f32 %v129_v1, %v128_v62  ;;  %v205_v62 = vlaneseq }
  0xa6   :  { %301 = vmatmul.msk.f32.vlgmr.msra.gmra.mxu0 %vm48_vm0, %v77_v54  ;;  %302 = vmatmul.msk.f32.vlgmr.msra.gmra.mxu1 %vm48_vm0, %v78_v42 }
  0xa7   :  { %v120_v61 = vrot.slane %v119_v60, 2  ;;  %v135_v6 = vmul.f32 %v130_v4, %v112_v52 }
  0xa9   :  { %v121_v63 = vadd.f32 %v120_v61, %v119_v60  ;;  %v136_v7 = vsel %vm48_vm0, %v135_v6, 0.0 }
  0xab   :  { %v122_v0 = vrot.slane %v121_v63, 1 }
  0xad   :  { %v123_v2 = vadd.f32 %v122_v0, %v121_v63 }
  0xaf   :  { %v131_v3 = vmul.f32 %v123_v2, %v111_v40 }
  0xb1   :  { %v132_v5 = vsel %vm48_vm0, %v131_v3, 0.0  ;;  %v206_v3 = vand.u32 127, %v205_v62 }
  0xb2   :  { %133 = vadd.xlane.f32.xlu2 %v132_v5 }
  0xba   :  { %137 = vadd.xlane.f32.xlu2 %v136_v7 }
 0x118   :  { %v116_v28 = vpop.xlane.xlu0 %115 }
 0x123   :  { %v248_v8 = vpop.f32.mrf.mxu1  ;;  %v245_v47 = vpop.f32.mrf.mxu0 }
 0x124   :  { %252 = vrot.lane.b32.xlu2 %v248_v8, %s401_s0  ;;  %256 = vrot.lane.b32.xlu1 %v248_v8, %s399_s18 }
 0x125   :  { %v134_v9 = vpop.xlane.xlu2 %133 }
 0x126   :  { %325 = vrcp.f32 %v134_v9  ;;  %vm144_vm13 = vweird.f32 %v134_v9  ;;  %v148_v15 = vand.u32 2147483647, %v134_v9  ;;  %v150_v16 = vand.u32 2147483648, %v134_v9 }
 0x128   :  { %vm149_vm0 = vcmp.eq.f32.partialorder %v148_v15, 8.507059e+37  ;;  %v151_v20 = vor.u32 1.1754944e-38, %v150_v16 }
 0x12c   :  { %v326_v10 = vpop.eup %325 }
 0x12d   :  { %v140_v11 = vmul.f32 %v326_v10, %v134_v9  ;;  %v138_v12 = vpop.xlane.xlu2 %137  ;;  %vm145_vm14 = vweird.f32 %v326_v10 }
 0x12e   :  { %327 = vrcp.f32 %v138_v12  ;;  %vm146_vm15 = vmor %vm144_vm13, %vm145_vm14  ;;  %vm159_vm1 = vweird.f32 %v138_v12  ;;  %v165_v21 = vand.u32 2147483648, %v138_v12  ;;  %v163_v24 = vand.u32 2147483647, %v138_v12 }
 0x12f   :  { %v141_v13 = vsub.f32 1.0, %v140_v11 }
 0x130   :  { %v166_v27 = vor.u32 1.1754944e-38, %v165_v21  ;;  %vm164_vm4 = vcmp.eq.f32.partialorder %v163_v24, 8.507059e+37 }
 0x131   :  { %v142_v14 = vmul.f32 %v326_v10, %v141_v13 }
 0x133   :  { %v143_v17 = vadd.f32 %v326_v10, %v142_v14 }
 0x134   :  { %v328_v18 = vpop.eup %327 }
 0x135   :  { %v155_v19 = vmul.f32 %v328_v18, %v138_v12  ;;  %v147_v23 = vsel %vm146_vm15, %v326_v10, %v143_v17  ;;  %vm160_vm2 = vweird.f32 %v328_v18 }
 0x136   :  { %v152_v26 = vsel %vm149_vm0, %v151_v20, %v147_v23  ;;  %vm161_vm3 = vmor %vm159_vm1, %vm160_vm2 }
 0x137   :  { %v156_v22 = vsub.f32 1.0, %v155_v19  ;;  %v153_v31 = vmul.f32 %v152_v26, %v116_v28 }
 0x139   :  { %v157_v25 = vmul.f32 %v328_v18, %v156_v22 }
 0x13b   :  { %v158_v29 = vadd.f32 %v328_v18, %v157_v25 }
 0x13d   :  { %v162_v30 = vsel %vm161_vm3, %v328_v18, %v158_v29 }
 0x13e   :  { %v167_v32 = vsel %vm164_vm4, %v166_v27, %v162_v30 }
 0x13f   :  { %v168_v33 = vmul.f32 %v167_v32, %v116_v28 }
 0x141   :  { %v169_v34 = vadd.f32 %v168_v33, %v153_v31 }
 0x143   :  { %v170_v35 = vmul.f32 0.5, %v169_v34 }
 0x145   :  { %v171_v36 = vrot.slane %v170_v35, 4 }
 0x147   :  { %v172_v37 = vmin.f32 %v170_v35, %v171_v36  ;;  %v181_v38 = vmax.f32 %v170_v35, %v171_v36 }
 0x149   :  { %v173_v39 = vrot.slane %v172_v37, 2  ;;  %v182_v40 = vrot.slane %v181_v38, 2 }
 0x14b   :  { %v174_v41 = vmin.f32 %v172_v37, %v173_v39  ;;  %v183_v42 = vmax.f32 %v181_v38, %v182_v40 }
 0x14d   :  { %v175_v43 = vrot.slane %v174_v41, 1  ;;  %v184_v44 = vrot.slane %v183_v42, 1 }
 0x14f   :  { %v176_v45 = vmin.f32 %v174_v41, %v175_v43  ;;  %v185_v46 = vmax.f32 %v183_v42, %v184_v44 }
 0x151   :  { %305 = vpush %v176_v45 }
 0x152   :  { %307 = vpush %v185_v46 }
 0x17e   :  { %v253_v1 = vpop.permute.xlu2 %252 }
 0x17f   :  { %v255_v4 = vsub.f32 %v245_v47, %v253_v1 }
 0x181   :  { %v260_v6 = vmul.f32 %v255_v4, %v255_v4 }
 0x182   :  { %s306_s1 = spop %305 }
 0x183   :  { %s308_s21 = spop %307  ;;  %v178_v61 = vstv %s306_s1 }
 0x184   :  { %s187_s22 = ssub.f32 %s308_s21, %s306_s1  ;;  %v179_v0 = vsub.f32 %v170_v35, %v178_v61 }
 0x186   :  { %v188_v51 = vstv %s187_s22 }
 0x187   :  { %329 = vrcp.f32 %v188_v51  ;;  %vm194_vm5 = vweird.f32 %v188_v51  ;;  %v200_v56 = vand.u32 2147483648, %v188_v51  ;;  %v198_v58 = vand.u32 2147483647, %v188_v51 }
 0x189   :  { %v201_v59 = vor.u32 1.1754944e-38, %v200_v56  ;;  %vm199_vm8 = vcmp.eq.f32.partialorder %v198_v58, 8.507059e+37 }
 0x18d   :  { %v330_v52 = vpop.eup %329 }
 0x18e   :  { %v190_v53 = vmul.f32 %v330_v52, %v188_v51  ;;  %vm195_vm6 = vweird.f32 %v330_v52 }
 0x18f   :  { %vm196_vm7 = vmor %vm194_vm5, %vm195_vm6 }
 0x190   :  { %v191_v54 = vsub.f32 1.0, %v190_v53 }
 0x192   :  { %v192_v55 = vmul.f32 %v330_v52, %v191_v54 }
 0x194   :  { %v193_v57 = vadd.f32 %v330_v52, %v192_v55 }
 0x196   :  { %v257_v48 = vpop.permute.xlu1 %256  ;;  %v197_v60 = vsel %vm196_vm7, %v330_v52, %v193_v57 }
 0x197   :  { %v259_v49 = vsub.f32 %v245_v47, %v257_v48  ;;  %v202_v63 = vsel %vm199_vm8, %v201_v59, %v197_v60 }
 0x198   :  { %v203_v2 = vmul.f32 %v202_v63, %v179_v0 }
 0x199   :  { %v261_v50 = vmul.f32 %v259_v49, %v259_v49 }
 0x19a   :  { %v207_v5 = vperm.slane %v203_v2, %v206_v3 }
 0x19b   :  { %263 = vrot.lane.b32.xlu0 %v261_v50, %s401_s0 }
 0x19c   :  { %v221_v9 = vmul.f32 %v207_v5, %v203_v2 }
 0x20d   :  { %v264_v7 = vpop.permute.xlu0 %263 }
 0x20e   :  { %v266_v8 = vadd.f32 %v264_v7, %v260_v6 }
 0x210   :  { %v267_v10 = vmul.f32 %v266_v8, %v221_v9 }
 0x212   :  { %v269_v11 = vsel %vm268_vm9, %v267_v10, 0.0 }
 0x213   :  { %270 = vadd.xlane.f32.xlu2 %v269_v11 }
 0x286   :  { %v271_v12 = vpop.xlane.xlu2 %270 }
 0x287   :  { %v272_v13 = vrot.slane %v271_v12, 4 }
 0x289   :  { %v273_v14 = vadd.f32 %v272_v13, %v271_v12 }
 0x28b   :  { %v274_v15 = vrot.slane %v273_v14, 2 }
 0x28d   :  { %v275_v16 = vadd.f32 %v274_v15, %v273_v14 }
 0x28f   :  { %v276_v17 = vrot.slane %v275_v16, 1 }
 0x291   :  { %v277_v18 = vadd.f32 %v276_v17, %v275_v16 }
 0x293   :  { %309 = vpush %v277_v18 }
 0x2c4   :  { %s310_s26 = spop %309 }
 0x2c5   :  { %s279_s27 = smul.f32 0.125, %s310_s26 }
 0x2c7   :  { %281 = sst [smem:[#allocation7]] %s279_s27 }
 0x2c8   :  { %290 = dma.smem_to_hbm %s402_s28, 16, %s288_s25, [#allocation4]  }
 0x2c9   :  { %395 = dma.done.wait [#allocation4], 16  }
 0x2ca   :  { %396 = vsyncadd [#allocation4], 4294967280 }
 0x2cb   :  { %295 = sfence }
 0x2cc   :  { %296 = vsyncpa [#allocation3], 1 }
 0x2cd   :  { %297 = vsyncpa [#allocation6], 1 }
 0x2ce   :  { %298 = vsyncpa [#allocation4], 1 }

</bundles_post_ra>
